<compile_context>
chip_gen: v6e
topology: v6e:2x2x1
jax: 0.10.0
libtpu: 0.0.40
codegen_flags: <defaults>
</compile_context>

<pallas_src>
import jax
import jax.numpy as jnp
from jax.experimental import pallas as pl
from jax.experimental.pallas import tpu as pltpu


def lstm_orth_seq_kernel(x_ref, h0_ref, c0_ref, wx_ref, wh_ref, b_ref,
                         hc_out_ref, h_scr, c_scr):
    """One grid step = one time step for one batch block.

    x_ref   : (B_BLK, I)      f32   input at time t (T dim squeezed away)
    h0_ref  : (B_BLK, H)      f32   initial hidden state
    c0_ref  : (B_BLK, H)      f32   initial cell state
    wx_ref  : (I, 4H)         bf16  fused input->gates weights [i,f,g,o]
    wh_ref  : (H, 4H)         bf16  fused hidden->gates weights [i,f,g,o]
    b_ref   : (1, 4H)         f32   fused bias (b_i2h + b_h2h)
    hc_out  : (B_BLK, 2H)     f32   [h_next | c_next] slab row for time t
    h_scr   : (B_BLK, H)      f32   carried hidden state (VMEM scratch)
    c_scr   : (B_BLK, H)      f32   carried cell state   (VMEM scratch)
    """
    t = pl.program_id(1)

    # Load the carried state from the initial-state inputs at t == 0.
    @pl.when(t == 0)
    def _():
        h_scr[...] = h0_ref[...]
        c_scr[...] = c0_ref[...]

    H = c_scr.shape[1]

    h = h_scr[...]                     # f32 carry
    c_prev = c_scr[...]                # f32 carry

    # Two accumulating bf16 MXU pushes into a f32 result; 4H is lane-dense.
    preact = jnp.dot(x_ref[...].astype(jnp.bfloat16), wx_ref[...],
                     preferred_element_type=jnp.float32)
    preact = preact + jnp.dot(h.astype(jnp.bfloat16), wh_ref[...],
                              preferred_element_type=jnp.float32)
    preact = preact + b_ref[...]       # single dense (1, 4H) broadcast add

    # Full-width activations: one sigmoid + one tanh over the whole (B, 4H)
    # vreg, then static lane slices per gate (order [i, f, g, o]).
    sig = jax.nn.sigmoid(preact)
    th = jnp.tanh(preact)
    i_gate = sig[:, 0 * H:1 * H]       # input gate
    f_gate = sig[:, 1 * H:2 * H]       # forget gate
    g_gate = th[:, 2 * H:3 * H]        # cell candidate
    o_gate = sig[:, 3 * H:4 * H]       # output gate

    c_next = f_gate * c_prev + i_gate * g_gate
    h_next = o_gate * jnp.tanh(c_next)

    # Carry the recurrent state in VMEM (f32, no bf16 round-trip).
    h_scr[...] = h_next
    c_scr[...] = c_next

    # Single lane-contiguous (B_BLK, 2H) store per step: [h_next | c_next].
    hc_out_ref[...] = jnp.concatenate([h_next, c_next], axis=-1).astype(
        hc_out_ref.dtype)


def lstm_orth_sequence(x_seq, h0, c0, wx_f, wh_f, b_f, *, b_block=None):
    """Run the LSTM_Orth cell over a sequence in ONE pallas_call.

    x_seq : (T, B, input_size)   f32
    h0,c0 : (B, hidden_size)     f32
    wx_f  : (input_size, 4H)     bf16, gates [i, f, g, o]
    wh_f  : (hidden_size, 4H)    bf16, gates [i, f, g, o]
    b_f   : (1, 4H)              f32
    returns (h_seq, c_seq), each (T, B, hidden_size) f32
    """
    T, B, I = x_seq.shape
    H = h0.shape[1]
    if b_block is None:
        b_block = B
    assert B % b_block == 0

    grid = (B // b_block, T)           # (parallel batch blocks, serial time)

    hc = pl.pallas_call(
        lstm_orth_seq_kernel,
        out_shape=jax.ShapeDtypeStruct((T, B, 2 * H), jnp.float32),
        grid=grid,
        in_specs=[
            # x streamed one time step at a time (T dim squeezed).
            pl.BlockSpec((None, b_block, I), lambda b, t: (t, b, 0)),
            # Initial state: only read at t == 0.
            pl.BlockSpec((b_block, H), lambda b, t: (b, 0)),
            pl.BlockSpec((b_block, H), lambda b, t: (b, 0)),
            # Weights / bias: constant index_map -> VMEM-resident all T steps.
            pl.BlockSpec((I, 4 * H), lambda b, t: (0, 0)),
            pl.BlockSpec((H, 4 * H), lambda b, t: (0, 0)),
            pl.BlockSpec((1, 4 * H), lambda b, t: (0, 0)),
        ],
        # One merged [h | c] slab row per step.
        out_specs=pl.BlockSpec((None, b_block, 2 * H), lambda b, t: (t, b, 0)),
        scratch_shapes=[
            pltpu.VMEM((b_block, H), jnp.float32),   # carried h
            pltpu.VMEM((b_block, H), jnp.float32),   # carried c
        ],
        compiler_params=pltpu.CompilerParams(
            dimension_semantics=("parallel", "arbitrary")),
    )(x_seq, h0, c0, wx_f, wh_f, b_f)

    h_seq = hc[..., :H]
    c_seq = hc[..., H:]
    return h_seq, c_seq


def lstm_orth_step(x, tuple_in, wx_f, wh_f, b_f):
    """Single cell step matching the PyTorch module's forward(x, (h, c))."""
    h, c = tuple_in
    h_seq, c_seq = lstm_orth_sequence(x[None, ...], h, c, wx_f, wh_f, b_f)
    return h_seq[0], c_seq[0]


def pack_lstm_params(wx, wh, b_i2h, b_h2h):
    """Fuse per-gate params into (I, 4H)/(H, 4H) bf16 weights and (1, 4H) f32 bias.

    wx   : (4, input_size, hidden_size)   per-gate input weights (x @ W form)
    wh   : (4, hidden_size, hidden_size)  per-gate hidden weights
    b_*  : (4, 1, hidden_size)            per-gate biases
    Gate order [i, f, g, o] is preserved along the fused lane axis.
    """
    n_gates, I, H = wx.shape
    wx_f = jnp.transpose(wx, (1, 0, 2)).reshape(I, n_gates * H)
    wh_f = jnp.transpose(wh, (1, 0, 2)).reshape(H, n_gates * H)
    b_f = (b_i2h + b_h2h).reshape(1, n_gates * H)
    # bf16 MXU operands; bias and all gating math stay f32.
    return (wx_f.astype(jnp.bfloat16), wh_f.astype(jnp.bfloat16),
            b_f.astype(jnp.float32))


def lstm_orth_ref_step(x, h, c, wx, wh, b):
    """Pure-JAX f32 reference mirroring the PyTorch forward (per-gate form)."""
    def pre_act(k):
        return x @ wx[k] + h @ wh[k] + b[k]
    i = jax.nn.sigmoid(pre_act(0))
    f = jax.nn.sigmoid(pre_act(1))
    g = jnp.tanh(pre_act(2))
    o = jax.nn.sigmoid(pre_act(3))
    c_next = f * c + i * g
    h_next = o * jnp.tanh(c_next)
    return h_next, c_next


if __name__ == "__main__":
    B = 8              # batch
    INPUT_SIZE = 16
    HIDDEN_SIZE = 32   # 4*H = 128 -> exactly lane-dense fused preactivation
    T = 8              # sequence length driven inside one pallas_call

    key = jax.random.PRNGKey(0)
    keys = jax.random.split(key, 8)

    # Deterministic synthetic parameters (PyTorch nn.Linear-like uniform init).
    lim_x = 1.0 / jnp.sqrt(INPUT_SIZE)
    lim_h = 1.0 / jnp.sqrt(HIDDEN_SIZE)
    # Per-gate weights [i, f, g, o], stored transposed so x @ W matches
    # PyTorch's x @ W.T with W (out, in).
    wx = jax.random.uniform(keys[0], (4, INPUT_SIZE, HIDDEN_SIZE),
                            jnp.float32, -lim_x, lim_x)
    wh = jax.random.uniform(keys[1], (4, HIDDEN_SIZE, HIDDEN_SIZE),
                            jnp.float32, -lim_h, lim_h)
    b_i2h = jax.random.uniform(keys[2], (4, 1, HIDDEN_SIZE),
                               jnp.float32, -lim_x, lim_x)
    b_h2h = jax.random.uniform(keys[3], (4, 1, HIDDEN_SIZE),
                               jnp.float32, -lim_h, lim_h)
    b = b_i2h + b_h2h

    # Fused bf16 parameters for the kernel (packed once, host side).
    wx_f, wh_f, b_f = pack_lstm_params(wx, wh, b_i2h, b_h2h)

    # Inputs: a T-step input sequence and the (h, c_prev) initial tuple.
    x_seq = jax.random.normal(keys[4], (T, B, INPUT_SIZE), jnp.float32)
    h0 = jax.random.normal(keys[5], (B, HIDDEN_SIZE), jnp.float32)
    c0 = jax.random.normal(keys[6], (B, HIDDEN_SIZE), jnp.float32)

    # --- single cell step (the module's exact forward signature) ---
    h1, c1 = lstm_orth_step(x_seq[0], (h0, c0), wx_f, wh_f, b_f)
    jax.block_until_ready((h1, c1))
    h1_ref, c1_ref = lstm_orth_ref_step(x_seq[0], h0, c0, wx, wh, b)
    assert h1.shape == (B, HIDDEN_SIZE) and c1.shape == (B, HIDDEN_SIZE)
    # bf16 MXU operands -> loosened tolerance (f32 gating keeps this tight).
    assert jnp.allclose(h1, h1_ref, atol=2e-2, rtol=2e-2)
    assert jnp.allclose(c1, c1_ref, atol=2e-2, rtol=2e-2)

    # --- full in-kernel T-step sequence ---
    h_seq, c_seq = lstm_orth_sequence(x_seq, h0, c0, wx_f, wh_f, b_f)
    jax.block_until_ready((h_seq, c_seq))

    h_ref, c_ref = h0, c0
    h_ref_seq, c_ref_seq = [], []
    for t in range(T):
        h_ref, c_ref = lstm_orth_ref_step(x_seq[t], h_ref, c_ref, wx, wh, b)
        h_ref_seq.append(h_ref)
        c_ref_seq.append(c_ref)
    h_ref_seq = jnp.stack(h_ref_seq)
    c_ref_seq = jnp.stack(c_ref_seq)

    assert h_seq.shape == (T, B, HIDDEN_SIZE)
    assert c_seq.shape == (T, B, HIDDEN_SIZE)
    # Slightly looser: bf16 matmul error compounds through the f32 carry.
    assert jnp.allclose(h_seq, h_ref_seq, atol=5e-2, rtol=5e-2)
    assert jnp.allclose(c_seq, c_ref_seq, atol=5e-2, rtol=5e-2)

    print("KERNEL_OK")
</pallas_src>

<mosaic_0001>
module attributes {stable_mosaic.version = 11 : i64} {
  func.func @lstm_orth_seq_kernel(%arg0: i32, %arg1: i32, %arg2: memref<1x8x16xf32, #tpu.memory_space<vmem>>, %arg3: memref<8x32xf32, #tpu.memory_space<vmem>>, %arg4: memref<8x32xf32, #tpu.memory_space<vmem>>, %arg5: memref<16x128xbf16, #tpu.memory_space<vmem>>, %arg6: memref<32x128xbf16, #tpu.memory_space<vmem>>, %arg7: memref<1x128xf32, #tpu.memory_space<vmem>>, %arg8: memref<1x8x64xf32, #tpu.memory_space<vmem>>, %arg9: memref<8x32xf32, #tpu.memory_space<vmem>>, %arg10: memref<8x32xf32, #tpu.memory_space<vmem>>) attributes {dimension_semantics = [#tpu.dimension_semantics<parallel>, #tpu.dimension_semantics<arbitrary>], iteration_bounds = array<i64: 1, 1>, scalar_prefetch = 0 : i64, scratch_operands = 2 : i64, tpu.core_type = #tpu.core_type<tc>, window_params = [{transform_indices = @transform_0, window_bounds = array<i64: 1, 8, 16>}, {transform_indices = @transform_1, window_bounds = array<i64: 8, 32>}, {transform_indices = @transform_2, window_bounds = array<i64: 8, 32>}, {pipeline_mode = #tpu.pipeline_mode<synchronous>, transform_indices = @transform_3, window_bounds = array<i64: 16, 128>}, {pipeline_mode = #tpu.pipeline_mode<synchronous>, transform_indices = @transform_4, window_bounds = array<i64: 32, 128>}, {pipeline_mode = #tpu.pipeline_mode<synchronous>, transform_indices = @transform_5, window_bounds = array<i64: 1, 128>}, {transform_indices = @transform_6, window_bounds = array<i64: 1, 8, 64>}]} {
    %c0_i32 = arith.constant 0 : i32
    %0 = arith.cmpi eq, %arg1, %c0_i32 : i32
    %1 = arith.extui %0 : i1 to i32
    %c0_i32_0 = arith.constant 0 : i32
    %2 = arith.cmpi ne, %1, %c0_i32_0 : i32
    scf.if %2 {
      %c0_22 = arith.constant 0 : index
      %c0_23 = arith.constant 0 : index
      %38 = vector.load %arg3[%c0_22, %c0_23] : memref<8x32xf32, #tpu.memory_space<vmem>>, vector<8x32xf32>
      %c0_24 = arith.constant 0 : index
      %c0_25 = arith.constant 0 : index
      %39 = vector.load %arg9[%c0_24, %c0_25] : memref<8x32xf32, #tpu.memory_space<vmem>>, vector<8x32xf32>
      tpu.vector_store %arg9[%c0_24, %c0_25], %38 {strides = array<i32>} : memref<8x32xf32, #tpu.memory_space<vmem>>, vector<8x32xf32>,
      %c0_26 = arith.constant 0 : index
      %c0_27 = arith.constant 0 : index
      %40 = vector.load %arg4[%c0_26, %c0_27] : memref<8x32xf32, #tpu.memory_space<vmem>>, vector<8x32xf32>
      %c0_28 = arith.constant 0 : index
      %c0_29 = arith.constant 0 : index
      %41 = vector.load %arg10[%c0_28, %c0_29] : memref<8x32xf32, #tpu.memory_space<vmem>>, vector<8x32xf32>
      tpu.vector_store %arg10[%c0_28, %c0_29], %40 {strides = array<i32>} : memref<8x32xf32, #tpu.memory_space<vmem>>, vector<8x32xf32>,
    } else {
    }
    %c0 = arith.constant 0 : index
    %c0_1 = arith.constant 0 : index
    %3 = vector.load %arg9[%c0, %c0_1] : memref<8x32xf32, #tpu.memory_space<vmem>>, vector<8x32xf32>
    %c0_2 = arith.constant 0 : index
    %c0_3 = arith.constant 0 : index
    %4 = vector.load %arg10[%c0_2, %c0_3] : memref<8x32xf32, #tpu.memory_space<vmem>>, vector<8x32xf32>
    %c0_4 = arith.constant 0 : index
    %c0_5 = arith.constant 0 : index
    %c0_6 = arith.constant 0 : index
    %5 = vector.load %arg2[%c0_4, %c0_5, %c0_6] : memref<1x8x16xf32, #tpu.memory_space<vmem>>, vector<1x8x16xf32>
    %6 = vector.shape_cast %5 : vector<1x8x16xf32> to vector<8x16xf32>
    %7 = arith.truncf %6 : vector<8x16xf32> to vector<8x16xbf16>
    %c0_7 = arith.constant 0 : index
    %c0_8 = arith.constant 0 : index
    %8 = vector.load %arg5[%c0_7, %c0_8] : memref<16x128xbf16, #tpu.memory_space<vmem>>, vector<16x128xbf16>
    %cst = arith.constant dense<0.000000e+00> : vector<8x128xf32>
    %9 = tpu.matmul %7, %8, %cst {dimension_numbers = #tpu.dot_dimension_numbers<[1], [0], [0], [1], [0, 0, 1, 1], [], []>} : vector<8x16xbf16>, vector<16x128xbf16>, vector<8x128xf32> -> vector<8x128xf32>
    %10 = arith.truncf %3 : vector<8x32xf32> to vector<8x32xbf16>
    %c0_9 = arith.constant 0 : index
    %c0_10 = arith.constant 0 : index
    %11 = vector.load %arg6[%c0_9, %c0_10] : memref<32x128xbf16, #tpu.memory_space<vmem>>, vector<32x128xbf16>
    %cst_11 = arith.constant dense<0.000000e+00> : vector<8x128xf32>
    %12 = tpu.matmul %10, %11, %cst_11 {dimension_numbers = #tpu.dot_dimension_numbers<[1], [0], [0], [1], [0, 0, 1, 1], [], []>} : vector<8x32xbf16>, vector<32x128xbf16>, vector<8x128xf32> -> vector<8x128xf32>
    %13 = arith.addf %9, %12 : vector<8x128xf32>
    %c0_12 = arith.constant 0 : index
    %c0_13 = arith.constant 0 : index
    %14 = vector.load %arg7[%c0_12, %c0_13] : memref<1x128xf32, #tpu.memory_space<vmem>>, vector<1x128xf32>
    %15 = vector.broadcast %14 : vector<1x128xf32> to vector<8x128xf32>
    %16 = arith.addf %13, %15 : vector<8x128xf32>
    %17 = arith.negf %16 : vector<8x128xf32>
    %18 = math.exp %17 : vector<8x128xf32>
    %cst_14 = arith.constant 1.000000e+00 : f32
    %19 = vector.broadcast %cst_14 : f32 to vector<8x128xf32>
    %20 = arith.addf %19, %18 : vector<8x128xf32>
    %21 = arith.divf %19, %20 : vector<8x128xf32>
    %22 = math.tanh %16 : vector<8x128xf32>
    %23 = vector.extract_strided_slice %21 {offsets = [0, 0], sizes = [8, 32], strides = [1, 1]} : vector<8x128xf32> to vector<8x32xf32>
    %24 = vector.extract_strided_slice %21 {offsets = [0, 32], sizes = [8, 32], strides = [1, 1]} : vector<8x128xf32> to vector<8x32xf32>
    %25 = vector.extract_strided_slice %22 {offsets = [0, 64], sizes = [8, 32], strides = [1, 1]} : vector<8x128xf32> to vector<8x32xf32>
    %26 = vector.extract_strided_slice %21 {offsets = [0, 96], sizes = [8, 32], strides = [1, 1]} : vector<8x128xf32> to vector<8x32xf32>
    %27 = arith.mulf %24, %4 : vector<8x32xf32>
    %28 = arith.mulf %23, %25 : vector<8x32xf32>
    %29 = arith.addf %27, %28 : vector<8x32xf32>
    %30 = math.tanh %29 : vector<8x32xf32>
    %31 = arith.mulf %26, %30 : vector<8x32xf32>
    %c0_15 = arith.constant 0 : index
    %c0_16 = arith.constant 0 : index
    %32 = vector.load %arg9[%c0_15, %c0_16] : memref<8x32xf32, #tpu.memory_space<vmem>>, vector<8x32xf32>
    tpu.vector_store %arg9[%c0_15, %c0_16], %31 {strides = array<i32>} : memref<8x32xf32, #tpu.memory_space<vmem>>, vector<8x32xf32>,
    %c0_17 = arith.constant 0 : index
    %c0_18 = arith.constant 0 : index
    %33 = vector.load %arg10[%c0_17, %c0_18] : memref<8x32xf32, #tpu.memory_space<vmem>>, vector<8x32xf32>
    tpu.vector_store %arg10[%c0_17, %c0_18], %29 {strides = array<i32>} : memref<8x32xf32, #tpu.memory_space<vmem>>, vector<8x32xf32>,
    %34 = tpu.concatenate %31, %29 in 1 : vector<8x32xf32>, vector<8x32xf32> -> vector<8x64xf32>
    %c0_19 = arith.constant 0 : index
    %c0_20 = arith.constant 0 : index
    %c0_21 = arith.constant 0 : index
    %35 = vector.load %arg8[%c0_19, %c0_20, %c0_21] : memref<1x8x64xf32, #tpu.memory_space<vmem>>, vector<1x8x64xf32>
    %36 = vector.shape_cast %35 : vector<1x8x64xf32> to vector<8x64xf32>
    %37 = vector.shape_cast %34 : vector<8x64xf32> to vector<1x8x64xf32>
    tpu.vector_store %arg8[%c0_19, %c0_20, %c0_21], %37 {strides = array<i32>} : memref<1x8x64xf32, #tpu.memory_space<vmem>>, vector<1x8x64xf32>,
    return
  }
  func.func @transform_0(%arg0: i32, %arg1: i32) -> (i32, i32, i32) {
    %c0_i32 = arith.constant 0 : i32
    %c0_i32_0 = arith.constant 0 : i32
    return %arg1, %arg0, %c0_i32 : i32, i32, i32
  }
  func.func @transform_1(%arg0: i32, %arg1: i32) -> (i32, i32) {
    %c0_i32 = arith.constant 0 : i32
    %c0_i32_0 = arith.constant 0 : i32
    return %arg0, %c0_i32 : i32, i32
  }
  func.func @transform_2(%arg0: i32, %arg1: i32) -> (i32, i32) {
    %c0_i32 = arith.constant 0 : i32
    %c0_i32_0 = arith.constant 0 : i32
    return %arg0, %c0_i32 : i32, i32
  }
  func.func @transform_3(%arg0: i32, %arg1: i32) -> (i32, i32) {
    %c0_i32 = arith.constant 0 : i32
    %c0_i32_0 = arith.constant 0 : i32
    %c0_i32_1 = arith.constant 0 : i32
    return %c0_i32, %c0_i32_0 : i32, i32
  }
  func.func @transform_4(%arg0: i32, %arg1: i32) -> (i32, i32) {
    %c0_i32 = arith.constant 0 : i32
    %c0_i32_0 = arith.constant 0 : i32
    %c0_i32_1 = arith.constant 0 : i32
    return %c0_i32, %c0_i32_0 : i32, i32
  }
  func.func @transform_5(%arg0: i32, %arg1: i32) -> (i32, i32) {
    %c0_i32 = arith.constant 0 : i32
    %c0_i32_0 = arith.constant 0 : i32
    %c0_i32_1 = arith.constant 0 : i32
    return %c0_i32, %c0_i32_0 : i32, i32
  }
  func.func @transform_6(%arg0: i32, %arg1: i32) -> (i32, i32, i32) {
    %c0_i32 = arith.constant 0 : i32
    %c0_i32_0 = arith.constant 0 : i32
    return %arg1, %arg0, %c0_i32 : i32, i32, i32
  }
}

</mosaic_0001>

<bundles_post_ra>
// kernel: tpu_custom_call.1
= control target key start
LH: loop header
LB: loop body
LE: loop exit
PB: predicated region body
PF: predicated region fallthrough
CT: control target
= control target key end

     0   :  { %11 = vsyncpa [#allocation5], 0  ;;  %s538_s0 = inlined_call_operand.hbm [shape: f32[1,8,16], index: 0, kind: input, shape index: {}]   ;;  %s539_s1 = inlined_call_operand.hbm [shape: f32[8,32], index: 1, kind: input, shape index: {}]   ;;  %s540_s2 = inlined_call_operand.hbm [shape: f32[8,32], index: 2, kind: input, shape index: {}]   ;;  %s541_s3 = inlined_call_operand.hbm [shape: bf16[16,128], index: 3, kind: input, shape index: {}]   ;;  %s542_s4 = inlined_call_operand.hbm [shape: bf16[32,128], index: 4, kind: input, shape index: {}]   ;;  %s543_s5 = inlined_call_operand.vmem [shape: f32[1,128], index: 5, kind: input, shape index: {}]   ;;  %s544_s6 = inlined_call_operand.hbm [shape: f32[1,8,64], index: 6, kind: output, shape index: {}]  }
   0x1   :  { %12 = vsyncpa [#allocation8], 0 }
   0x2   :  { %13 = vsyncpa [#allocation11], 0 }
   0x3   :  { %14 = vsyncpa [#allocation6], 0  ;;  %s456_s21 = smov [#allocation7]   ;;  %s457_s23 = smov [#allocation10]  }
   0x4   :  { %s31_s22 = sshll.u32 %s456_s21, 4  ;;  %s50_s24 = sshll.u32 %s457_s23, 4  ;;  %s32_s22 = int_to_ptr.vmem [resolvable:$true] %s31_s22  ;;  %s51_s24 = int_to_ptr.vmem [resolvable:$true] %s50_s24 }
   0x5   :  { %s336_s25 = scalar_lea.vmem %s32_s22, 128  ;;  %p341_p1 = scmp.lt.s32.totalorder %s32_s22, %s32_s22 }
   0x6   :  { %p337_p0 = scmp.ne.s32.totalorder %s32_s22, %s336_s25  ;;  %p342_p2 = scmp.lt.s32.totalorder %s336_s25, %s336_s25 }
   0x8   :  { %p343_p3 = por %p342_p2, %p341_p1 }
   0xa   :  { %p344_p4 = pnand %p343_p3, %p337_p0 }
   0xc   :  { %347 = shalt.err (!%p344_p4)
}
   0xd   :  { %34 = dma.hbm_to_vmem [thread:$0]  %s539_s1, 128, %s32_s22, [#allocation8]  }
   0xe   :  { %s356_s28 = scalar_lea.vmem %s51_s24, 128  ;;  %p361_p6 = scmp.lt.s32.totalorder %s51_s24, %s51_s24 }
   0xf   :  { %p357_p5 = scmp.ne.s32.totalorder %s51_s24, %s356_s28  ;;  %p362_p7 = scmp.lt.s32.totalorder %s356_s28, %s356_s28 }
  0x11   :  { %p363_p8 = por %p362_p7, %p361_p6 }
  0x13   :  { %p364_p9 = pnand %p363_p8, %p357_p5 }
  0x15   :  { %367 = shalt.err (!%p364_p9)
}
  0x16   :  { %s458_s29 = smov 64   ;;  %s459_s30 = smov 4  }
  0x17   :  { %56 = dma.hbm_to_vmem [thread:$0]  %s541_s3, 128, %s51_s24, [#allocation11], %s458_s29, %s458_s29, %s459_s30  }
  0x18   :  { %s460_s9 = smov [#allocation4]   ;;  %s461_s11 = smov [#allocation9]  }
  0x19   :  { %s21_s10 = sshll.u32 %s460_s9, 4  ;;  %s41_s1 = sshll.u32 %s461_s11, 4  ;;  %s22_s10 = int_to_ptr.vmem [resolvable:$true] %s21_s10  ;;  %s42_s1 = int_to_ptr.vmem [resolvable:$true] %s41_s1 }
  0x1a   :  { %s376_s12 = scalar_lea.vmem %s22_s10, 128  ;;  %p381_p11 = scmp.lt.s32.totalorder %s22_s10, %s22_s10 }
  0x1b   :  { %p377_p10 = scmp.ne.s32.totalorder %s22_s10, %s376_s12  ;;  %p382_p12 = scmp.lt.s32.totalorder %s376_s12, %s376_s12 }
  0x1d   :  { %p383_p13 = por %p382_p12, %p381_p11 }
  0x1f   :  { %p384_p0 = pnand %p383_p13, %p377_p10 }
  0x21   :  { %387 = shalt.err (!%p384_p0)
}
  0x22   :  { %24 = dma.hbm_to_vmem [thread:$0]  %s538_s0, 128, %s22_s10, [#allocation5]  }
  0x23   :  { %s396_s15 = scalar_lea.vmem %s42_s1, 128  ;;  %p401_p2 = scmp.lt.s32.totalorder %s42_s1, %s42_s1 }
  0x24   :  { %p397_p1 = scmp.ne.s32.totalorder %s42_s1, %s396_s15  ;;  %p402_p3 = scmp.lt.s32.totalorder %s396_s15, %s396_s15 }
  0x26   :  { %p403_p4 = por %p402_p3, %p401_p2 }
  0x28   :  { %p404_p5 = pnand %p403_p4, %p397_p1 }
  0x2a   :  { %407 = shalt.err (!%p404_p5)
}
  0x2b   :  { %44 = dma.hbm_to_vmem [thread:$0]  %s540_s2, 128, %s42_s1, [#allocation8]  }
  0x2c   :  { %s462_s17 = smov [#allocation12]  }
  0x2d   :  { %s62_s18 = sshll.u32 %s462_s17, 4  ;;  %s63_s18 = int_to_ptr.vmem [resolvable:$true] %s62_s18 }
  0x2e   :  { %s416_s19 = scalar_lea.vmem %s63_s18, 256  ;;  %p421_p7 = scmp.lt.s32.totalorder %s63_s18, %s63_s18 }
  0x2f   :  { %p417_p6 = scmp.ne.s32.totalorder %s63_s18, %s416_s19  ;;  %p422_p8 = scmp.lt.s32.totalorder %s416_s19, %s416_s19 }
  0x31   :  { %p423_p9 = por %p422_p8, %p421_p7 }
  0x33   :  { %p424_p10 = pnand %p423_p9, %p417_p6 }
  0x35   :  { %427 = shalt.err (!%p424_p10)
}
  0x36   :  { %68 = dma.hbm_to_vmem [thread:$0]  %s542_s4, 256, %s63_s18, [#allocation11], %s458_s29, %s458_s29, %s459_s30  }
  0x37   :  { %448 = dma.done.wait [#allocation5], 128  }
  0x38   :  { %449 = vsyncadd [#allocation5], 4294967168 }
  0x39   :  { %450 = dma.done.wait [#allocation8], 256  }
  0x3a   :  { %451 = vsyncadd [#allocation8], 4294967040 }
  0x3b   :  { %452 = dma.done.wait [#allocation11], 384  }
  0x3c   :  { %453 = vsyncadd [#allocation11], 4294966912  ;;  %v463_v0 = vmov 0.0   ;;  %vm464_vm0 = vmmov 0   ;;  %v317_v1 = vld [vmem:[#allocation10] sm:$0xff]   ;;  %v318_v2 = vld [vmem:[#allocation12 + $0x8] sm:$0xff]  }
  0x3d   :  { %299 = vmatprep.subr.bf16.mxu1 %v463_v0  ;;  %291 = vmatprep.subr.bf16.mxu0 %v463_v0  ;;  %vm92_vm1 = vcmask 261120   ;;  %v98_v3 = vld [vmem:[#allocation4] sm:$0xff]  ;;  %vm169_vm2 = vcmask 130048   ;;  %v91_v6 = vld [vmem:[#allocation7] sm:$0xff]  ;;  %v94_v7 = vld [vmem:[#allocation9] sm:$0xff]  ;;  %s465_s21 = smov 32  }
  0x3e   :  { %301 = vmatprep.mubr.msk.bf16.mxu1 %vm464_vm0, %v463_v0  ;;  %295 = vmatprep.mubr.msk.bf16.mxu0 %vm464_vm0, %v463_v0  ;;  %v99_v4 = vpack.c.bf16 %v98_v3, %v98_v3  ;;  %v319_v5 = vld [vmem:[#allocation12] sm:$0xff]   ;;  %93 = vst.msk [vmem:[#allocation2] sm:$0xff] %vm92_vm1, %v91_v6  ;;  %95 = vst.msk [vmem:[#allocation3] sm:$0xff] %vm92_vm1, %v94_v7  ;;  %v284_v15 = vld [vmem:[%s543_s5] ss:$0 sm:$0xff]  ;;  %s466_s5 = smov 96  }
  0x3f   :  { %300 = vmatpush3.bf16.msra.mxu1 %v317_v1  ;;  %292 = vmatpush3.bf16.msra.mxu0 %v318_v2  ;;  %s467_s22 = smov [#allocation13]   ;;  %vm260_vm3 = vcmask 523264  }
  0x40   :  { %293 = vmatprep.subr.bf16.mxu0 %v463_v0  ;;  %s268_s23 = sshll.u32 %s467_s22, 4  ;;  %s269_s23 = int_to_ptr.vmem [resolvable:$true] %s268_s23 }
  0x41   :  { %s428_s24 = scalar_lea.vmem %s269_s23, 128  ;;  %p433_p12 = scmp.lt.s32.totalorder %s269_s23, %s269_s23 }
  0x42   :  { %302 = vmatmul.mubr.msk.bf16.vlgmr.msra.gmra.mxu1 %vm169_vm2, %v99_v4  ;;  %p429_p11 = scmp.ne.s32.totalorder %s269_s23, %s428_s24  ;;  %p434_p13 = scmp.lt.s32.totalorder %s428_s24, %s428_s24 }
  0x43   :  { %294 = vmatpush3.bf16.msra.mxu0 %v319_v5 }
  0x44   :  { %p435_p0 = por %p434_p13, %p433_p12 }
  0x45   :  { %v96_v8 = vld [vmem:[#allocation2] sm:$0xff]  ;;  %v97_v22 = vld [vmem:[#allocation3] sm:$0xff] }
  0x46   :  { %v102_v9 = vpack.c.bf16 %v96_v8, %v96_v8  ;;  %p436_p1 = pnand %p435_p0, %p429_p11 }
  0x48   :  { %296 = vmatmul.mubr.msk.bf16.vlgmr.msra.gmra.mxu0 %vm92_vm1, %v102_v9 }
 0x102   :  { %v207_v10 = vpop.f32.mrf.mxu1 }
 0x104   :  { %v303_v11 = vpop.f32.mrf.mxu1 }
 0x106   :  { %v210_v12 = vpop.f32.mrf.mxu1 }
 0x108   :  { %v304_v13 = vpop.f32.mrf.mxu1  ;;  %v157_v14 = vpop.f32.mrf.mxu0 }
 0x109   :  { %v208_v16 = vadd.f32 %v207_v10, %v157_v14 }
 0x10a   :  { %v297_v17 = vpop.f32.mrf.mxu0 }
 0x10b   :  { %v220_v18 = vadd.f32 %v284_v15, %v208_v16 }
 0x10c   :  { %v160_v19 = vpop.f32.mrf.mxu0 }
 0x10d   :  { %320 = vtanh.f32 %v220_v18  ;;  %v285_v23 = vmul.f32 -1.442695, %v220_v18 }
 0x10e   :  { %v298_v20 = vpop.f32.mrf.mxu0 }
 0x10f   :  { %322 = vpow2.f32 %v285_v23 }
 0x11a   :  { %v321_v21 = vpop.eup %320 }
 0x11b   :  { %234 = vrot.lane.b32.xlu0 %v321_v21, %s458_s29 }
 0x11c   :  { %v323_v24 = vpop.eup %322 }
 0x11d   :  { %v224_v25 = vadd.f32 1.0, %v323_v24 }
 0x11f   :  { %229 = vrot.lane.b32.xlu0 %v97_v22, %s465_s21  ;;  %324 = vrcp.f32 %v224_v25 }
 0x12c   :  { %v325_v26 = vpop.eup %324 }
 0x18d   :  { %v235_v27 = vpop.permute.xlu0 %234 }
 0x18e   :  { %v237_v28 = vmul.f32 %v325_v26, %v235_v27 }
 0x190   :  { %239 = vrot.lane.b32.xlu1 %v237_v28, %s465_s21 }
 0x191   :  { %v230_v29 = vpop.permute.xlu0 %229 }
 0x192   :  { %v232_v30 = vmul.f32 %v325_v26, %v230_v29 }
 0x202   :  { %v240_v31 = vpop.permute.xlu1 %239 }
 0x203   :  { %v242_v32 = vadd.f32 %v240_v31, %v232_v30 }
 0x205   :  { %326 = vtanh.f32 %v242_v32 }
 0x212   :  { %v327_v33 = vpop.eup %326 }
 0x213   :  { %245 = vrot.lane.b32.xlu1 %v327_v33, %s458_s29 }
 0x217   :  { %255 = vrot.lane.b32.xlu1 %v242_v32, %s466_s5 }
 0x285   :  { %v246_v34 = vpop.permute.xlu1 %245 }
 0x286   :  { %v248_v35 = vmul.f32 %v325_v26, %v246_v34 }
 0x288   :  { %250 = vrot.lane.b32.xlu0 %v248_v35, %s465_s21 }
 0x289   :  { %v256_v36 = vpop.permute.xlu1 %255 }
 0x28a   :  { %258 = vst.msk [vmem:[#allocation3] sm:$0xff] %vm92_vm1, %v256_v36 }
 0x2fa   :  { %v251_v37 = vpop.permute.xlu0 %250 }
 0x2fb   :  { %253 = vst.msk [vmem:[#allocation2] sm:$0xff] %vm92_vm1, %v251_v37  ;;  %v259_v38 = vsel %vm92_vm1, %v251_v37, %v242_v32 }
 0x2fc   :  { %261 = vst.msk [vmem:[#allocation13] sm:$0xff] %vm260_vm3, %v259_v38 }
 0x2fd   :  { %439 = shalt.err (!%p436_p1)
}
 0x2fe   :  { %271 = dma.vmem_to_hbm [thread:$0]  %s269_s23, 128, %s544_s6, [#allocation6]  }
 0x2ff   :  { %454 = dma.done.wait [#allocation6], 128  }
 0x300   :  { %455 = vsyncadd [#allocation6], 4294967168 }
 0x301   :  { %275 = vsyncpa [#allocation5], 1 }
 0x302   :  { %276 = vsyncpa [#allocation8], 1 }
 0x303   :  { %277 = vsyncpa [#allocation11], 1 }
 0x304   :  { %278 = vsyncpa [#allocation6], 1 }

</bundles_post_ra>
